<compile_context>
chip_gen: v7x
topology: tpu7x:2x2x1
jax: 0.10.0
libtpu: 0.0.40
codegen_flags: <defaults>
</compile_context>

<pallas_src>
import numpy as np
import jax
import jax.numpy as jnp
from jax.experimental import pallas as pl
from jax.experimental.pallas import tpu as pltpu

# ----------------------------- problem dimensions -----------------------------
BATCH = 2          # batch size
SEQ = 8            # sequence length (recurrence steps)
IN_FEATURES = 4    # raw input features D
N_CLASS = 3        # C
N_STATE = 2        # K
N_COMPONENT = 2    # M

H = 1 + IN_FEATURES + IN_FEATURES * (IN_FEATURES + 1) // 2   # expanded features (15)
KKC = N_STATE * N_STATE * N_CLASS                            # K*K*C   (12)
N = N_COMPONENT * KKC                                        # M*K*K*C (24)
# upper-triangle pairs in np.triu_indices order (matches reference expansion)
TRIU_PAIRS = [(i, j) for i in range(IN_FEATURES) for j in range(i, IN_FEATURES)]


# --------------------------------- Pallas kernel -------------------------------
def rllgmn_kernel(x_ref, w_ref, out_ref):
    b, t, d = x_ref.shape
    # (B,T,D) -> (B*T, D); leading-dim collapse is a layout no-op, row = b*T + ts
    x2 = x_ref[...].reshape(b * t, d)

    # ---- fused LLGMN quadratic expansion + single linear layer (hoisted) ------
    # I2 = 1*W[0] + x @ W[1:1+D] + sum_{i<=j} (x_i*x_j) * W[1+D+p]
    wb = w_ref[0:1, :]                                  # (1, N)  bias row
    wl = w_ref[1:1 + d, :]                              # (D, N)  linear rows
    wq = w_ref[1 + d:, :]                               # (D(D+1)/2, N) quad rows
    i2 = jnp.dot(x2, wl, preferred_element_type=jnp.float32) + wb      # (B*T, N)
    for p, (i, j) in enumerate(TRIU_PAIRS):
        i2 = i2 + (x2[:, i:i + 1] * x2[:, j:j + 1]) * wq[p:p + 1, :]

    # ---- time-independent work, all off the serial recurrence chain -----------
    # TODO(synk): no max-subtraction / log-sum-exp stabilisation (matches the
    # reference cell); exp overflows for large |W.x|.
    o2 = jnp.exp(i2)                                    # (B*T, M*K*K'*C)
    o3 = o2[:, :KKC] + o2[:, KKC:]                      # sum over m -> (B*T, K*K'*C)
    o3 = o3.reshape(b, t, KKC)                          # (B, T, K*K'*C) layout no-op

    # Pre-extract every per-step (B, C) tile so the extract/select ops are not
    # interleaved into the serial dependency chain of the recurrence.
    parts = [[[o3[:, ts, (k * N_STATE + kp) * N_CLASS:(k * N_STATE + kp + 1) * N_CLASS]
               for kp in range(N_STATE)]
              for k in range(N_STATE)]
             for ts in range(t)]

    # ---- sequential recurrence, fully unrolled, everything stays in vregs -----
    h = None                                            # hidden == 1 at t=0
    for ts in range(t):
        i4 = []
        for kp in range(N_STATE):
            if h is None:                               # t = 0: skip multiplies
                acc = parts[ts][0][kp]
                for k in range(1, N_STATE):
                    acc = acc + parts[ts][k][kp]
            else:
                acc = h[0] * parts[ts][0][kp]
                for k in range(1, N_STATE):
                    acc = acc + h[k] * parts[ts][k][kp]
            i4.append(acc)                              # (B, C)
        tot = i4[0]
        for kp in range(1, N_STATE):
            tot = tot + i4[kp]
        denom = jnp.sum(tot, axis=-1, keepdims=True)    # (B, 1): sum over c, k'
        inv = 1.0 / denom                               # one exact reciprocal / step
        h = [v * inv for v in i4]                       # new hidden (per k')

    out = h[0]
    for kp in range(1, N_STATE):
        out = out + h[kp]                               # output = sum over k'
    out_ref[...] = out


@jax.jit
def rllgmn_forward(x, w):
    bsz = x.shape[0]
    return pl.pallas_call(
        rllgmn_kernel,
        out_shape=jax.ShapeDtypeStruct((bsz, N_CLASS), jnp.float32),
        in_specs=[pl.BlockSpec(memory_space=pltpu.MemorySpace.VMEM),
                  pl.BlockSpec(memory_space=pltpu.MemorySpace.VMEM)],
        out_specs=pl.BlockSpec(memory_space=pltpu.MemorySpace.VMEM),
    )(x.astype(jnp.float32), w.astype(jnp.float32))


# ------------------------------ pure-JAX reference ------------------------------
def nonlinear_transform(x):
    """(B, T, D) -> (B, T, H) quadratic LLGMN expansion [1, x, x_i x_j (i<=j)]."""
    b, t, d = x.shape
    ones = jnp.ones((b, t, 1), x.dtype)
    quad = x[..., :, None] * x[..., None, :]            # (B, T, D, D)
    iu, ju = np.triu_indices(d)
    return jnp.concatenate([ones, x, quad[..., iu, ju]], axis=-1)


def rllgmn_reference(x, w):
    b, t, _ = x.shape
    xe = nonlinear_transform(x.astype(jnp.float32))
    w5 = w.reshape(H, N_COMPONENT, N_STATE, N_STATE, N_CLASS)     # (H, m, k, k', c)
    hidden = jnp.ones((b, N_CLASS, N_STATE), jnp.float32)
    output = jnp.ones((b, N_CLASS), jnp.float32)
    for i in range(t):
        i2 = jnp.einsum("bh,hmkjc->bmkjc", xe[:, i], w5)
        o3 = jnp.exp(i2).sum(1)                                   # (b, k, k', c)
        i4 = jnp.einsum("bck,bkjc->bcj", hidden, o3)              # (b, c, k')
        o4 = i4 / i4.sum(axis=(1, 2), keepdims=True)
        hidden = o4
        output = o4.sum(-1)
    return output


# ------------------------------------- main -------------------------------------
if __name__ == "__main__":
    key = jax.random.PRNGKey(0)
    kx, kw = jax.random.split(key)
    x = jax.random.normal(kx, (BATCH, SEQ, IN_FEATURES), dtype=jnp.float32)
    # deterministic synthetic weights for the cell's single linear layer (no bias)
    w = 0.1 * jax.random.normal(kw, (H, N), dtype=jnp.float32)

    out = jax.block_until_ready(rllgmn_forward(x, w))

    ref = rllgmn_reference(x, w)
    assert out.shape == (BATCH, N_CLASS)
    np.testing.assert_allclose(np.asarray(out), np.asarray(ref), rtol=1e-5, atol=1e-5)

    print("KERNEL_OK")
</pallas_src>

<mosaic_0001>
module attributes {stable_mosaic.version = 11 : i64} {
  func.func @rllgmn_kernel(%arg0: memref<2x8x4xf32, #tpu.memory_space<vmem>>, %arg1: memref<15x24xf32, #tpu.memory_space<vmem>>, %arg2: memref<2x3xf32, #tpu.memory_space<vmem>>) attributes {dimension_semantics = [], scalar_prefetch = 0 : i64, scratch_operands = 0 : i64, tpu.core_type = #tpu.core_type<tc>} {
    %c0 = arith.constant 0 : index
    %c0_0 = arith.constant 0 : index
    %c0_1 = arith.constant 0 : index
    %0 = vector.load %arg0[%c0, %c0_0, %c0_1] : memref<2x8x4xf32, #tpu.memory_space<vmem>>, vector<2x8x4xf32>
    %1 = vector.shape_cast %0 : vector<2x8x4xf32> to vector<16x4xf32>
    %c0_2 = arith.constant 0 : index
    %c0_3 = arith.constant 0 : index
    %2 = vector.load %arg1[%c0_2, %c0_3] : memref<15x24xf32, #tpu.memory_space<vmem>>, vector<1x24xf32>
    %c1 = arith.constant 1 : index
    %c0_4 = arith.constant 0 : index
    %3 = vector.load %arg1[%c1, %c0_4] : memref<15x24xf32, #tpu.memory_space<vmem>>, vector<4x24xf32>
    %c5 = arith.constant 5 : index
    %c0_5 = arith.constant 0 : index
    %4 = vector.load %arg1[%c5, %c0_5] : memref<15x24xf32, #tpu.memory_space<vmem>>, vector<10x24xf32>
    %cst = arith.constant dense<0.000000e+00> : vector<16x24xf32>
    %5 = tpu.matmul %1, %3, %cst {dimension_numbers = #tpu.dot_dimension_numbers<[1], [0], [0], [1], [0, 0, 1, 1], [], []>} : vector<16x4xf32>, vector<4x24xf32>, vector<16x24xf32> -> vector<16x24xf32>
    %6 = vector.broadcast %2 : vector<1x24xf32> to vector<16x24xf32>
    %7 = arith.addf %5, %6 : vector<16x24xf32>
    %8 = vector.extract_strided_slice %1 {offsets = [0, 0], sizes = [16, 1], strides = [1, 1]} : vector<16x4xf32> to vector<16x1xf32>
    %9 = vector.extract_strided_slice %1 {offsets = [0, 0], sizes = [16, 1], strides = [1, 1]} : vector<16x4xf32> to vector<16x1xf32>
    %10 = arith.mulf %8, %9 : vector<16x1xf32>
    %11 = vector.extract_strided_slice %4 {offsets = [0, 0], sizes = [1, 24], strides = [1, 1]} : vector<10x24xf32> to vector<1x24xf32>
    %12 = vector.broadcast %10 : vector<16x1xf32> to vector<16x24xf32>
    %13 = vector.broadcast %11 : vector<1x24xf32> to vector<16x24xf32>
    %14 = arith.mulf %12, %13 : vector<16x24xf32>
    %15 = arith.addf %7, %14 : vector<16x24xf32>
    %16 = vector.extract_strided_slice %1 {offsets = [0, 0], sizes = [16, 1], strides = [1, 1]} : vector<16x4xf32> to vector<16x1xf32>
    %17 = vector.extract_strided_slice %1 {offsets = [0, 1], sizes = [16, 1], strides = [1, 1]} : vector<16x4xf32> to vector<16x1xf32>
    %18 = arith.mulf %16, %17 : vector<16x1xf32>
    %19 = vector.extract_strided_slice %4 {offsets = [1, 0], sizes = [1, 24], strides = [1, 1]} : vector<10x24xf32> to vector<1x24xf32>
    %20 = vector.broadcast %18 : vector<16x1xf32> to vector<16x24xf32>
    %21 = vector.broadcast %19 : vector<1x24xf32> to vector<16x24xf32>
    %22 = arith.mulf %20, %21 : vector<16x24xf32>
    %23 = arith.addf %15, %22 : vector<16x24xf32>
    %24 = vector.extract_strided_slice %1 {offsets = [0, 0], sizes = [16, 1], strides = [1, 1]} : vector<16x4xf32> to vector<16x1xf32>
    %25 = vector.extract_strided_slice %1 {offsets = [0, 2], sizes = [16, 1], strides = [1, 1]} : vector<16x4xf32> to vector<16x1xf32>
    %26 = arith.mulf %24, %25 : vector<16x1xf32>
    %27 = vector.extract_strided_slice %4 {offsets = [2, 0], sizes = [1, 24], strides = [1, 1]} : vector<10x24xf32> to vector<1x24xf32>
    %28 = vector.broadcast %26 : vector<16x1xf32> to vector<16x24xf32>
    %29 = vector.broadcast %27 : vector<1x24xf32> to vector<16x24xf32>
    %30 = arith.mulf %28, %29 : vector<16x24xf32>
    %31 = arith.addf %23, %30 : vector<16x24xf32>
    %32 = vector.extract_strided_slice %1 {offsets = [0, 0], sizes = [16, 1], strides = [1, 1]} : vector<16x4xf32> to vector<16x1xf32>
    %33 = vector.extract_strided_slice %1 {offsets = [0, 3], sizes = [16, 1], strides = [1, 1]} : vector<16x4xf32> to vector<16x1xf32>
    %34 = arith.mulf %32, %33 : vector<16x1xf32>
    %35 = vector.extract_strided_slice %4 {offsets = [3, 0], sizes = [1, 24], strides = [1, 1]} : vector<10x24xf32> to vector<1x24xf32>
    %36 = vector.broadcast %34 : vector<16x1xf32> to vector<16x24xf32>
    %37 = vector.broadcast %35 : vector<1x24xf32> to vector<16x24xf32>
    %38 = arith.mulf %36, %37 : vector<16x24xf32>
    %39 = arith.addf %31, %38 : vector<16x24xf32>
    %40 = vector.extract_strided_slice %1 {offsets = [0, 1], sizes = [16, 1], strides = [1, 1]} : vector<16x4xf32> to vector<16x1xf32>
    %41 = vector.extract_strided_slice %1 {offsets = [0, 1], sizes = [16, 1], strides = [1, 1]} : vector<16x4xf32> to vector<16x1xf32>
    %42 = arith.mulf %40, %41 : vector<16x1xf32>
    %43 = vector.extract_strided_slice %4 {offsets = [4, 0], sizes = [1, 24], strides = [1, 1]} : vector<10x24xf32> to vector<1x24xf32>
    %44 = vector.broadcast %42 : vector<16x1xf32> to vector<16x24xf32>
    %45 = vector.broadcast %43 : vector<1x24xf32> to vector<16x24xf32>
    %46 = arith.mulf %44, %45 : vector<16x24xf32>
    %47 = arith.addf %39, %46 : vector<16x24xf32>
    %48 = vector.extract_strided_slice %1 {offsets = [0, 1], sizes = [16, 1], strides = [1, 1]} : vector<16x4xf32> to vector<16x1xf32>
    %49 = vector.extract_strided_slice %1 {offsets = [0, 2], sizes = [16, 1], strides = [1, 1]} : vector<16x4xf32> to vector<16x1xf32>
    %50 = arith.mulf %48, %49 : vector<16x1xf32>
    %51 = vector.extract_strided_slice %4 {offsets = [5, 0], sizes = [1, 24], strides = [1, 1]} : vector<10x24xf32> to vector<1x24xf32>
    %52 = vector.broadcast %50 : vector<16x1xf32> to vector<16x24xf32>
    %53 = vector.broadcast %51 : vector<1x24xf32> to vector<16x24xf32>
    %54 = arith.mulf %52, %53 : vector<16x24xf32>
    %55 = arith.addf %47, %54 : vector<16x24xf32>
    %56 = vector.extract_strided_slice %1 {offsets = [0, 1], sizes = [16, 1], strides = [1, 1]} : vector<16x4xf32> to vector<16x1xf32>
    %57 = vector.extract_strided_slice %1 {offsets = [0, 3], sizes = [16, 1], strides = [1, 1]} : vector<16x4xf32> to vector<16x1xf32>
    %58 = arith.mulf %56, %57 : vector<16x1xf32>
    %59 = vector.extract_strided_slice %4 {offsets = [6, 0], sizes = [1, 24], strides = [1, 1]} : vector<10x24xf32> to vector<1x24xf32>
    %60 = vector.broadcast %58 : vector<16x1xf32> to vector<16x24xf32>
    %61 = vector.broadcast %59 : vector<1x24xf32> to vector<16x24xf32>
    %62 = arith.mulf %60, %61 : vector<16x24xf32>
    %63 = arith.addf %55, %62 : vector<16x24xf32>
    %64 = vector.extract_strided_slice %1 {offsets = [0, 2], sizes = [16, 1], strides = [1, 1]} : vector<16x4xf32> to vector<16x1xf32>
    %65 = vector.extract_strided_slice %1 {offsets = [0, 2], sizes = [16, 1], strides = [1, 1]} : vector<16x4xf32> to vector<16x1xf32>
    %66 = arith.mulf %64, %65 : vector<16x1xf32>
    %67 = vector.extract_strided_slice %4 {offsets = [7, 0], sizes = [1, 24], strides = [1, 1]} : vector<10x24xf32> to vector<1x24xf32>
    %68 = vector.broadcast %66 : vector<16x1xf32> to vector<16x24xf32>
    %69 = vector.broadcast %67 : vector<1x24xf32> to vector<16x24xf32>
    %70 = arith.mulf %68, %69 : vector<16x24xf32>
    %71 = arith.addf %63, %70 : vector<16x24xf32>
    %72 = vector.extract_strided_slice %1 {offsets = [0, 2], sizes = [16, 1], strides = [1, 1]} : vector<16x4xf32> to vector<16x1xf32>
    %73 = vector.extract_strided_slice %1 {offsets = [0, 3], sizes = [16, 1], strides = [1, 1]} : vector<16x4xf32> to vector<16x1xf32>
    %74 = arith.mulf %72, %73 : vector<16x1xf32>
    %75 = vector.extract_strided_slice %4 {offsets = [8, 0], sizes = [1, 24], strides = [1, 1]} : vector<10x24xf32> to vector<1x24xf32>
    %76 = vector.broadcast %74 : vector<16x1xf32> to vector<16x24xf32>
    %77 = vector.broadcast %75 : vector<1x24xf32> to vector<16x24xf32>
    %78 = arith.mulf %76, %77 : vector<16x24xf32>
    %79 = arith.addf %71, %78 : vector<16x24xf32>
    %80 = vector.extract_strided_slice %1 {offsets = [0, 3], sizes = [16, 1], strides = [1, 1]} : vector<16x4xf32> to vector<16x1xf32>
    %81 = vector.extract_strided_slice %1 {offsets = [0, 3], sizes = [16, 1], strides = [1, 1]} : vector<16x4xf32> to vector<16x1xf32>
    %82 = arith.mulf %80, %81 : vector<16x1xf32>
    %83 = vector.extract_strided_slice %4 {offsets = [9, 0], sizes = [1, 24], strides = [1, 1]} : vector<10x24xf32> to vector<1x24xf32>
    %84 = vector.broadcast %82 : vector<16x1xf32> to vector<16x24xf32>
    %85 = vector.broadcast %83 : vector<1x24xf32> to vector<16x24xf32>
    %86 = arith.mulf %84, %85 : vector<16x24xf32>
    %87 = arith.addf %79, %86 : vector<16x24xf32>
    %88 = math.exp %87 : vector<16x24xf32>
    %89 = vector.extract_strided_slice %88 {offsets = [0, 0], sizes = [16, 12], strides = [1, 1]} : vector<16x24xf32> to vector<16x12xf32>
    %90 = vector.extract_strided_slice %88 {offsets = [0, 12], sizes = [16, 12], strides = [1, 1]} : vector<16x24xf32> to vector<16x12xf32>
    %91 = arith.addf %89, %90 : vector<16x12xf32>
    %92 = vector.shape_cast %91 : vector<16x12xf32> to vector<2x8x12xf32>
    %93 = vector.extract_strided_slice %92 {offsets = [0, 0, 0], sizes = [2, 1, 3], strides = [1, 1, 1]} : vector<2x8x12xf32> to vector<2x1x3xf32>
    %94 = vector.shape_cast %93 : vector<2x1x3xf32> to vector<2x3xf32>
    %95 = vector.extract_strided_slice %92 {offsets = [0, 0, 3], sizes = [2, 1, 3], strides = [1, 1, 1]} : vector<2x8x12xf32> to vector<2x1x3xf32>
    %96 = vector.shape_cast %95 : vector<2x1x3xf32> to vector<2x3xf32>
    %97 = vector.extract_strided_slice %92 {offsets = [0, 0, 6], sizes = [2, 1, 3], strides = [1, 1, 1]} : vector<2x8x12xf32> to vector<2x1x3xf32>
    %98 = vector.shape_cast %97 : vector<2x1x3xf32> to vector<2x3xf32>
    %99 = vector.extract_strided_slice %92 {offsets = [0, 0, 9], sizes = [2, 1, 3], strides = [1, 1, 1]} : vector<2x8x12xf32> to vector<2x1x3xf32>
    %100 = vector.shape_cast %99 : vector<2x1x3xf32> to vector<2x3xf32>
    %101 = vector.extract_strided_slice %92 {offsets = [0, 1, 0], sizes = [2, 1, 3], strides = [1, 1, 1]} : vector<2x8x12xf32> to vector<2x1x3xf32>
    %102 = vector.shape_cast %101 : vector<2x1x3xf32> to vector<2x3xf32>
    %103 = vector.extract_strided_slice %92 {offsets = [0, 1, 3], sizes = [2, 1, 3], strides = [1, 1, 1]} : vector<2x8x12xf32> to vector<2x1x3xf32>
    %104 = vector.shape_cast %103 : vector<2x1x3xf32> to vector<2x3xf32>
    %105 = vector.extract_strided_slice %92 {offsets = [0, 1, 6], sizes = [2, 1, 3], strides = [1, 1, 1]} : vector<2x8x12xf32> to vector<2x1x3xf32>
    %106 = vector.shape_cast %105 : vector<2x1x3xf32> to vector<2x3xf32>
    %107 = vector.extract_strided_slice %92 {offsets = [0, 1, 9], sizes = [2, 1, 3], strides = [1, 1, 1]} : vector<2x8x12xf32> to vector<2x1x3xf32>
    %108 = vector.shape_cast %107 : vector<2x1x3xf32> to vector<2x3xf32>
    %109 = vector.extract_strided_slice %92 {offsets = [0, 2, 0], sizes = [2, 1, 3], strides = [1, 1, 1]} : vector<2x8x12xf32> to vector<2x1x3xf32>
    %110 = vector.shape_cast %109 : vector<2x1x3xf32> to vector<2x3xf32>
    %111 = vector.extract_strided_slice %92 {offsets = [0, 2, 3], sizes = [2, 1, 3], strides = [1, 1, 1]} : vector<2x8x12xf32> to vector<2x1x3xf32>
    %112 = vector.shape_cast %111 : vector<2x1x3xf32> to vector<2x3xf32>
    %113 = vector.extract_strided_slice %92 {offsets = [0, 2, 6], sizes = [2, 1, 3], strides = [1, 1, 1]} : vector<2x8x12xf32> to vector<2x1x3xf32>
    %114 = vector.shape_cast %113 : vector<2x1x3xf32> to vector<2x3xf32>
    %115 = vector.extract_strided_slice %92 {offsets = [0, 2, 9], sizes = [2, 1, 3], strides = [1, 1, 1]} : vector<2x8x12xf32> to vector<2x1x3xf32>
    %116 = vector.shape_cast %115 : vector<2x1x3xf32> to vector<2x3xf32>
    %117 = vector.extract_strided_slice %92 {offsets = [0, 3, 0], sizes = [2, 1, 3], strides = [1, 1, 1]} : vector<2x8x12xf32> to vector<2x1x3xf32>
    %118 = vector.shape_cast %117 : vector<2x1x3xf32> to vector<2x3xf32>
    %119 = vector.extract_strided_slice %92 {offsets = [0, 3, 3], sizes = [2, 1, 3], strides = [1, 1, 1]} : vector<2x8x12xf32> to vector<2x1x3xf32>
    %120 = vector.shape_cast %119 : vector<2x1x3xf32> to vector<2x3xf32>
    %121 = vector.extract_strided_slice %92 {offsets = [0, 3, 6], sizes = [2, 1, 3], strides = [1, 1, 1]} : vector<2x8x12xf32> to vector<2x1x3xf32>
    %122 = vector.shape_cast %121 : vector<2x1x3xf32> to vector<2x3xf32>
    %123 = vector.extract_strided_slice %92 {offsets = [0, 3, 9], sizes = [2, 1, 3], strides = [1, 1, 1]} : vector<2x8x12xf32> to vector<2x1x3xf32>
    %124 = vector.shape_cast %123 : vector<2x1x3xf32> to vector<2x3xf32>
    %125 = vector.extract_strided_slice %92 {offsets = [0, 4, 0], sizes = [2, 1, 3], strides = [1, 1, 1]} : vector<2x8x12xf32> to vector<2x1x3xf32>
    %126 = vector.shape_cast %125 : vector<2x1x3xf32> to vector<2x3xf32>
    %127 = vector.extract_strided_slice %92 {offsets = [0, 4, 3], sizes = [2, 1, 3], strides = [1, 1, 1]} : vector<2x8x12xf32> to vector<2x1x3xf32>
    %128 = vector.shape_cast %127 : vector<2x1x3xf32> to vector<2x3xf32>
    %129 = vector.extract_strided_slice %92 {offsets = [0, 4, 6], sizes = [2, 1, 3], strides = [1, 1, 1]} : vector<2x8x12xf32> to vector<2x1x3xf32>
    %130 = vector.shape_cast %129 : vector<2x1x3xf32> to vector<2x3xf32>
    %131 = vector.extract_strided_slice %92 {offsets = [0, 4, 9], sizes = [2, 1, 3], strides = [1, 1, 1]} : vector<2x8x12xf32> to vector<2x1x3xf32>
    %132 = vector.shape_cast %131 : vector<2x1x3xf32> to vector<2x3xf32>
    %133 = vector.extract_strided_slice %92 {offsets = [0, 5, 0], sizes = [2, 1, 3], strides = [1, 1, 1]} : vector<2x8x12xf32> to vector<2x1x3xf32>
    %134 = vector.shape_cast %133 : vector<2x1x3xf32> to vector<2x3xf32>
    %135 = vector.extract_strided_slice %92 {offsets = [0, 5, 3], sizes = [2, 1, 3], strides = [1, 1, 1]} : vector<2x8x12xf32> to vector<2x1x3xf32>
    %136 = vector.shape_cast %135 : vector<2x1x3xf32> to vector<2x3xf32>
    %137 = vector.extract_strided_slice %92 {offsets = [0, 5, 6], sizes = [2, 1, 3], strides = [1, 1, 1]} : vector<2x8x12xf32> to vector<2x1x3xf32>
    %138 = vector.shape_cast %137 : vector<2x1x3xf32> to vector<2x3xf32>
    %139 = vector.extract_strided_slice %92 {offsets = [0, 5, 9], sizes = [2, 1, 3], strides = [1, 1, 1]} : vector<2x8x12xf32> to vector<2x1x3xf32>
    %140 = vector.shape_cast %139 : vector<2x1x3xf32> to vector<2x3xf32>
    %141 = vector.extract_strided_slice %92 {offsets = [0, 6, 0], sizes = [2, 1, 3], strides = [1, 1, 1]} : vector<2x8x12xf32> to vector<2x1x3xf32>
    %142 = vector.shape_cast %141 : vector<2x1x3xf32> to vector<2x3xf32>
    %143 = vector.extract_strided_slice %92 {offsets = [0, 6, 3], sizes = [2, 1, 3], strides = [1, 1, 1]} : vector<2x8x12xf32> to vector<2x1x3xf32>
    %144 = vector.shape_cast %143 : vector<2x1x3xf32> to vector<2x3xf32>
    %145 = vector.extract_strided_slice %92 {offsets = [0, 6, 6], sizes = [2, 1, 3], strides = [1, 1, 1]} : vector<2x8x12xf32> to vector<2x1x3xf32>
    %146 = vector.shape_cast %145 : vector<2x1x3xf32> to vector<2x3xf32>
    %147 = vector.extract_strided_slice %92 {offsets = [0, 6, 9], sizes = [2, 1, 3], strides = [1, 1, 1]} : vector<2x8x12xf32> to vector<2x1x3xf32>
    %148 = vector.shape_cast %147 : vector<2x1x3xf32> to vector<2x3xf32>
    %149 = vector.extract_strided_slice %92 {offsets = [0, 7, 0], sizes = [2, 1, 3], strides = [1, 1, 1]} : vector<2x8x12xf32> to vector<2x1x3xf32>
    %150 = vector.shape_cast %149 : vector<2x1x3xf32> to vector<2x3xf32>
    %151 = vector.extract_strided_slice %92 {offsets = [0, 7, 3], sizes = [2, 1, 3], strides = [1, 1, 1]} : vector<2x8x12xf32> to vector<2x1x3xf32>
    %152 = vector.shape_cast %151 : vector<2x1x3xf32> to vector<2x3xf32>
    %153 = vector.extract_strided_slice %92 {offsets = [0, 7, 6], sizes = [2, 1, 3], strides = [1, 1, 1]} : vector<2x8x12xf32> to vector<2x1x3xf32>
    %154 = vector.shape_cast %153 : vector<2x1x3xf32> to vector<2x3xf32>
    %155 = vector.extract_strided_slice %92 {offsets = [0, 7, 9], sizes = [2, 1, 3], strides = [1, 1, 1]} : vector<2x8x12xf32> to vector<2x1x3xf32>
    %156 = vector.shape_cast %155 : vector<2x1x3xf32> to vector<2x3xf32>
    %157 = arith.addf %94, %98 : vector<2x3xf32>
    %158 = arith.addf %96, %100 : vector<2x3xf32>
    %159 = arith.addf %157, %158 : vector<2x3xf32>
    %cst_6 = arith.constant dense<0.000000e+00> : vector<2xf32>
    %160 = vector.multi_reduction <add>, %159, %cst_6 [1] : vector<2x3xf32> to vector<2xf32>
    %161 = vector.shape_cast %160 : vector<2xf32> to vector<2x1xf32>
    %cst_7 = arith.constant 1.000000e+00 : f32
    %162 = vector.broadcast %cst_7 : f32 to vector<2x1xf32>
    %163 = arith.divf %162, %161 : vector<2x1xf32>
    %164 = vector.broadcast %163 : vector<2x1xf32> to vector<2x3xf32>
    %165 = arith.mulf %157, %164 : vector<2x3xf32>
    %166 = vector.broadcast %163 : vector<2x1xf32> to vector<2x3xf32>
    %167 = arith.mulf %158, %166 : vector<2x3xf32>
    %168 = arith.mulf %165, %102 : vector<2x3xf32>
    %169 = arith.mulf %167, %106 : vector<2x3xf32>
    %170 = arith.addf %168, %169 : vector<2x3xf32>
    %171 = arith.mulf %165, %104 : vector<2x3xf32>
    %172 = arith.mulf %167, %108 : vector<2x3xf32>
    %173 = arith.addf %171, %172 : vector<2x3xf32>
    %174 = arith.addf %170, %173 : vector<2x3xf32>
    %cst_8 = arith.constant dense<0.000000e+00> : vector<2xf32>
    %175 = vector.multi_reduction <add>, %174, %cst_8 [1] : vector<2x3xf32> to vector<2xf32>
    %176 = vector.shape_cast %175 : vector<2xf32> to vector<2x1xf32>
    %cst_9 = arith.constant 1.000000e+00 : f32
    %177 = vector.broadcast %cst_9 : f32 to vector<2x1xf32>
    %178 = arith.divf %177, %176 : vector<2x1xf32>
    %179 = vector.broadcast %178 : vector<2x1xf32> to vector<2x3xf32>
    %180 = arith.mulf %170, %179 : vector<2x3xf32>
    %181 = vector.broadcast %178 : vector<2x1xf32> to vector<2x3xf32>
    %182 = arith.mulf %173, %181 : vector<2x3xf32>
    %183 = arith.mulf %180, %110 : vector<2x3xf32>
    %184 = arith.mulf %182, %114 : vector<2x3xf32>
    %185 = arith.addf %183, %184 : vector<2x3xf32>
    %186 = arith.mulf %180, %112 : vector<2x3xf32>
    %187 = arith.mulf %182, %116 : vector<2x3xf32>
    %188 = arith.addf %186, %187 : vector<2x3xf32>
    %189 = arith.addf %185, %188 : vector<2x3xf32>
    %cst_10 = arith.constant dense<0.000000e+00> : vector<2xf32>
    %190 = vector.multi_reduction <add>, %189, %cst_10 [1] : vector<2x3xf32> to vector<2xf32>
    %191 = vector.shape_cast %190 : vector<2xf32> to vector<2x1xf32>
    %cst_11 = arith.constant 1.000000e+00 : f32
    %192 = vector.broadcast %cst_11 : f32 to vector<2x1xf32>
    %193 = arith.divf %192, %191 : vector<2x1xf32>
    %194 = vector.broadcast %193 : vector<2x1xf32> to vector<2x3xf32>
    %195 = arith.mulf %185, %194 : vector<2x3xf32>
    %196 = vector.broadcast %193 : vector<2x1xf32> to vector<2x3xf32>
    %197 = arith.mulf %188, %196 : vector<2x3xf32>
    %198 = arith.mulf %195, %118 : vector<2x3xf32>
    %199 = arith.mulf %197, %122 : vector<2x3xf32>
    %200 = arith.addf %198, %199 : vector<2x3xf32>
    %201 = arith.mulf %195, %120 : vector<2x3xf32>
    %202 = arith.mulf %197, %124 : vector<2x3xf32>
    %203 = arith.addf %201, %202 : vector<2x3xf32>
    %204 = arith.addf %200, %203 : vector<2x3xf32>
    %cst_12 = arith.constant dense<0.000000e+00> : vector<2xf32>
    %205 = vector.multi_reduction <add>, %204, %cst_12 [1] : vector<2x3xf32> to vector<2xf32>
    %206 = vector.shape_cast %205 : vector<2xf32> to vector<2x1xf32>
    %cst_13 = arith.constant 1.000000e+00 : f32
    %207 = vector.broadcast %cst_13 : f32 to vector<2x1xf32>
    %208 = arith.divf %207, %206 : vector<2x1xf32>
    %209 = vector.broadcast %208 : vector<2x1xf32> to vector<2x3xf32>
    %210 = arith.mulf %200, %209 : vector<2x3xf32>
    %211 = vector.broadcast %208 : vector<2x1xf32> to vector<2x3xf32>
    %212 = arith.mulf %203, %211 : vector<2x3xf32>
    %213 = arith.mulf %210, %126 : vector<2x3xf32>
    %214 = arith.mulf %212, %130 : vector<2x3xf32>
    %215 = arith.addf %213, %214 : vector<2x3xf32>
    %216 = arith.mulf %210, %128 : vector<2x3xf32>
    %217 = arith.mulf %212, %132 : vector<2x3xf32>
    %218 = arith.addf %216, %217 : vector<2x3xf32>
    %219 = arith.addf %215, %218 : vector<2x3xf32>
    %cst_14 = arith.constant dense<0.000000e+00> : vector<2xf32>
    %220 = vector.multi_reduction <add>, %219, %cst_14 [1] : vector<2x3xf32> to vector<2xf32>
    %221 = vector.shape_cast %220 : vector<2xf32> to vector<2x1xf32>
    %cst_15 = arith.constant 1.000000e+00 : f32
    %222 = vector.broadcast %cst_15 : f32 to vector<2x1xf32>
    %223 = arith.divf %222, %221 : vector<2x1xf32>
    %224 = vector.broadcast %223 : vector<2x1xf32> to vector<2x3xf32>
    %225 = arith.mulf %215, %224 : vector<2x3xf32>
    %226 = vector.broadcast %223 : vector<2x1xf32> to vector<2x3xf32>
    %227 = arith.mulf %218, %226 : vector<2x3xf32>
    %228 = arith.mulf %225, %134 : vector<2x3xf32>
    %229 = arith.mulf %227, %138 : vector<2x3xf32>
    %230 = arith.addf %228, %229 : vector<2x3xf32>
    %231 = arith.mulf %225, %136 : vector<2x3xf32>
    %232 = arith.mulf %227, %140 : vector<2x3xf32>
    %233 = arith.addf %231, %232 : vector<2x3xf32>
    %234 = arith.addf %230, %233 : vector<2x3xf32>
    %cst_16 = arith.constant dense<0.000000e+00> : vector<2xf32>
    %235 = vector.multi_reduction <add>, %234, %cst_16 [1] : vector<2x3xf32> to vector<2xf32>
    %236 = vector.shape_cast %235 : vector<2xf32> to vector<2x1xf32>
    %cst_17 = arith.constant 1.000000e+00 : f32
    %237 = vector.broadcast %cst_17 : f32 to vector<2x1xf32>
    %238 = arith.divf %237, %236 : vector<2x1xf32>
    %239 = vector.broadcast %238 : vector<2x1xf32> to vector<2x3xf32>
    %240 = arith.mulf %230, %239 : vector<2x3xf32>
    %241 = vector.broadcast %238 : vector<2x1xf32> to vector<2x3xf32>
    %242 = arith.mulf %233, %241 : vector<2x3xf32>
    %243 = arith.mulf %240, %142 : vector<2x3xf32>
    %244 = arith.mulf %242, %146 : vector<2x3xf32>
    %245 = arith.addf %243, %244 : vector<2x3xf32>
    %246 = arith.mulf %240, %144 : vector<2x3xf32>
    %247 = arith.mulf %242, %148 : vector<2x3xf32>
    %248 = arith.addf %246, %247 : vector<2x3xf32>
    %249 = arith.addf %245, %248 : vector<2x3xf32>
    %cst_18 = arith.constant dense<0.000000e+00> : vector<2xf32>
    %250 = vector.multi_reduction <add>, %249, %cst_18 [1] : vector<2x3xf32> to vector<2xf32>
    %251 = vector.shape_cast %250 : vector<2xf32> to vector<2x1xf32>
    %cst_19 = arith.constant 1.000000e+00 : f32
    %252 = vector.broadcast %cst_19 : f32 to vector<2x1xf32>
    %253 = arith.divf %252, %251 : vector<2x1xf32>
    %254 = vector.broadcast %253 : vector<2x1xf32> to vector<2x3xf32>
    %255 = arith.mulf %245, %254 : vector<2x3xf32>
    %256 = vector.broadcast %253 : vector<2x1xf32> to vector<2x3xf32>
    %257 = arith.mulf %248, %256 : vector<2x3xf32>
    %258 = arith.mulf %255, %150 : vector<2x3xf32>
    %259 = arith.mulf %257, %154 : vector<2x3xf32>
    %260 = arith.addf %258, %259 : vector<2x3xf32>
    %261 = arith.mulf %255, %152 : vector<2x3xf32>
    %262 = arith.mulf %257, %156 : vector<2x3xf32>
    %263 = arith.addf %261, %262 : vector<2x3xf32>
    %264 = arith.addf %260, %263 : vector<2x3xf32>
    %cst_20 = arith.constant dense<0.000000e+00> : vector<2xf32>
    %265 = vector.multi_reduction <add>, %264, %cst_20 [1] : vector<2x3xf32> to vector<2xf32>
    %266 = vector.shape_cast %265 : vector<2xf32> to vector<2x1xf32>
    %cst_21 = arith.constant 1.000000e+00 : f32
    %267 = vector.broadcast %cst_21 : f32 to vector<2x1xf32>
    %268 = arith.divf %267, %266 : vector<2x1xf32>
    %269 = vector.broadcast %268 : vector<2x1xf32> to vector<2x3xf32>
    %270 = arith.mulf %260, %269 : vector<2x3xf32>
    %271 = vector.broadcast %268 : vector<2x1xf32> to vector<2x3xf32>
    %272 = arith.mulf %263, %271 : vector<2x3xf32>
    %273 = arith.addf %270, %272 : vector<2x3xf32>
    %c0_22 = arith.constant 0 : index
    %c0_23 = arith.constant 0 : index
    %274 = vector.load %arg2[%c0_22, %c0_23] : memref<2x3xf32, #tpu.memory_space<vmem>>, vector<2x3xf32>
    tpu.vector_store %arg2[%c0_22, %c0_23], %273 {strides = array<i32>} : memref<2x3xf32, #tpu.memory_space<vmem>>, vector<2x3xf32>,
    return
  }
}

</mosaic_0001>

<bundles_post_ra>
// kernel: rllgmn_forward.1
= control target key start
LH: loop header
LB: loop body
LE: loop exit
PB: predicated region body
PF: predicated region fallthrough
CT: control target
= control target key end

     0   :  { %s842_s13 = smov 127   ;;  %s843_s14 = smov 126   ;;  %vm29_vm0 = vcmask 1043456   ;;  %vm22_vm1 = vcmask 31744   ;;  %s1031_s0 = inlined_call_operand.vmem [shape: f32[2,8,4], index: 0, kind: input, shape index: {}]   ;;  %s1032_s1 = inlined_call_operand.vmem [shape: f32[15,24], index: 1, kind: input, shape index: {}]   ;;  %s1033_s2 = inlined_call_operand.hbm [shape: f32[2,3], index: 2, kind: output, shape index: {}]  }
   0x1   :  { %v13_v0 = vld [vmem:[%s1031_s0 + $0x8] sm:$0xff]  ;;  %v15_v1 = vld [vmem:[%s1032_s1 + $0x1] sm:$0xf] }
   0x2   :  { %130 = vrot.lane.b32.xlu0 %v13_v0, %s842_s13  ;;  %156 = vrot.lane.b32.xlu1 %v13_v0, %s843_s14  ;;  %v12_v2 = vld [vmem:[%s1031_s0] sm:$0xff] }
   0x3   :  { %7 = vsyncpa [#allocation3], 0  ;;  %769 = vmatprep.subr.msk.mxu0 %vm29_vm0, %v15_v1  ;;  %771 = vmatprep.mubr.msk.f32.mxu0 %vm22_vm1, %v12_v2  ;;  %v844_v3 = vmov 0   ;;  %v845_v4 = vmov 1   ;;  %s846_s17 = smov 125   ;;  %v108_v5 = vmul.f32 %v12_v2, %v12_v2  ;;  %v109_v6 = vmul.f32 %v13_v0, %v13_v0  ;;  %v16_v31 = vld [vmem:[%s1032_s1 + $0x5] sm:$0xff] }
   0x4   :  { %770 = vmatpush3.msk.msra.mxu0 %vm29_vm0, %v15_v1  ;;  %785 = vset.pattern.permute.xlu1 %v844_v3  ;;  %v847_v7 = vmov 2   ;;  %v848_v20 = vmov 3   ;;  %v120_v26 = vlaneseq  ;;  %v762_v36 = vld [vmem:[%s1032_s1] ss:$0 sm:$0xff]  ;;  %s850_s23 = smov 122   ;;  %vm339_vm2 = vcmask 1041409  }
   0x5   :  { %772 = vmatmul.mubr.msk.f32.vlgmr.msra.gmra.mrb[0].mxu0 %vm22_vm1, %v13_v0  ;;  %787 = vset.pattern.permute.xlu0 %v845_v4  ;;  %vm342_vm3 = vcmask 17408   ;;  %s851_s24 = smov 119   ;;  %s852_s25 = smov [#allocation2]  }
   0x6   :  { %128 = vrot.lane.b32.xlu0 %v12_v2, %s842_s13  ;;  %154 = vrot.lane.b32.xlu1 %v12_v2, %s843_s14  ;;  %v879_v27 = vshrl.u32 %v120_v26, 7  ;;  %s754_s26 = sshll.u32 %s852_s25, 4  ;;  %s755_s26 = int_to_ptr.vmem [resolvable:$true] %s754_s26 }
   0x7   :  { %s818_s27 = scalar_lea.vmem %s755_s26, 32  ;;  %p823_p1 = scmp.lt.s32.totalorder %s755_s26, %s755_s26 }
   0x8   :  { %v122_v30 = vsub.s32 0, %v879_v27  ;;  %v148_v33 = vsub.s32 1, %v879_v27  ;;  %v174_v37 = vsub.s32 2, %v879_v27  ;;  %v200_v43 = vsub.s32 3, %v879_v27  ;;  %p819_p0 = scmp.ne.s32.totalorder %s755_s26, %s818_s27  ;;  %p824_p2 = scmp.lt.s32.totalorder %s818_s27, %s818_s27 }
   0x9   :  { %v216_v55 = vsub.s32 4, %v879_v27  ;;  %v232_v61 = vsub.s32 5, %v879_v27 }
   0xa   :  { %182 = vrot.lane.b32.xlu0 %v13_v0, %s846_s17  ;;  %180 = vrot.lane.b32.xlu1 %v12_v2, %s846_s17  ;;  %v123_v35 = vrot.slane %v16_v31, %v122_v30  ;;  %v149_v40 = vrot.slane %v16_v31, %v148_v33  ;;  %v175_v46 = vrot.slane %v16_v31, %v174_v37  ;;  %p825_p3 = por %p824_p2, %p823_p1 }
   0xb   :  { %v201_v51 = vrot.slane %v16_v31, %v200_v43  ;;  %v217_v1 = vrot.slane %v16_v31, %v216_v55 }
   0xc   :  { %p826_p4 = pnand %p825_p3, %p819_p0 }
   0xe   :  { %112 = vperm.xlu1 %785, %v108_v5   ;;  %207 = vperm.xlu0 %787, %v108_v5  }
  0x12   :  { %786 = vset.pattern.permute.xlu1 %v845_v4  ;;  %788 = vset.pattern.permute.xlu0 %v847_v7 }
  0x13   :  { %211 = vperm.xlu1 %786, %v109_v6   ;;  %259 = vperm.xlu0 %788, %v109_v6  }
  0x17   :  { %790 = vset.pattern.permute.xlu1 %v847_v7  ;;  %789 = vset.pattern.permute.xlu0 %v844_v3 }
  0x18   :  { %255 = vperm.xlu1 %790, %v108_v5   ;;  %117 = vperm.xlu0 %789, %v109_v6  }
  0x1c   :  { %791 = vset.pattern.permute.xlu1 %v844_v3  ;;  %v248_v3 = vsub.s32 6, %v879_v27 }
  0x74   :  { %v131_v8 = vpop.permute.xlu0 %130  ;;  %v157_v9 = vpop.permute.xlu1 %156 }
  0x75   :  { %v135_v10 = vmul.f32 %v131_v8, %v13_v0  ;;  %v161_v11 = vmul.f32 %v157_v9, %v13_v0  ;;  %v233_v8 = vrot.slane %v16_v31, %v232_v61 }
  0x77   :  { %143 = vperm.xlu1 %791, %v135_v10  }
  0x78   :  { %v129_v12 = vpop.permute.xlu0 %128  ;;  %v155_v13 = vpop.permute.xlu1 %154 }
  0x79   :  { %v134_v14 = vmul.f32 %v129_v12, %v12_v2  ;;  %v160_v15 = vmul.f32 %v155_v13, %v12_v2  ;;  %v249_v12 = vrot.slane %v16_v31, %v248_v3 }
  0x7b   :  { %138 = vperm.xlu0 %789, %v134_v14   ;;  %169 = vperm.xlu1 %791, %v161_v11  }
  0x7c   :  { %v183_v16 = vpop.permute.xlu0 %182  ;;  %v181_v17 = vpop.permute.xlu1 %180 }
  0x7d   :  { %v187_v18 = vmul.f32 %v183_v16, %v13_v0  ;;  %v186_v19 = vmul.f32 %v181_v17, %v12_v2 }
  0x7f   :  { %164 = vperm.xlu0 %789, %v160_v15   ;;  %195 = vperm.xlu1 %791, %v187_v18  }
  0x83   :  { %190 = vperm.xlu0 %789, %v186_v19   ;;  %792 = vset.pattern.permute.xlu1 %v845_v4  ;;  %v17_v19 = vld [vmem:[%s1032_s1 + $0xd] sm:$0x3]  ;;  %s849_s1 = smov 116  }
  0x84   :  { %227 = vperm.xlu1 %792, %v135_v10  }
  0x87   :  { %793 = vset.pattern.permute.xlu0 %v845_v4 }
  0x88   :  { %243 = vperm.xlu0 %793, %v161_v11   ;;  %223 = vperm.xlu1 %792, %v134_v14  }
  0x8c   :  { %796 = vset.pattern.permute.xlu0 %v847_v7  ;;  %239 = vperm.xlu1 %792, %v160_v15  }
  0x8d   :  { %271 = vperm.xlu0 %796, %v134_v14   ;;  %v113_v23 = vpop.permute.xlu1 %112  ;;  %v208_v24 = vpop.permute.xlu0 %207 }
  0x8e   :  { %v124_v44 = vmul.f32 %v123_v35, %v113_v23 }
  0x90   :  { %794 = vset.pattern.permute.xlu1 %v847_v7 }
  0x91   :  { %797 = vset.pattern.permute.xlu0 %v848_v20  ;;  %275 = vperm.xlu1 %794, %v135_v10  }
  0x92   :  { %287 = vperm.xlu0 %797, %v108_v5   ;;  %v212_v25 = vpop.permute.xlu1 %211  ;;  %v881_v28 = vpop.permute.xlu0 %259  ;;  %v218_v5 = vmul.f32 %v217_v1, %v208_v24 }
  0x93   :  { %v219_v11 = vmul.f32 %v217_v1, %v212_v25 }
  0x95   :  { %795 = vset.pattern.permute.xlu1 %v848_v20 }
  0x96   :  { %291 = vperm.xlu1 %795, %v109_v6   ;;  %v264_v6 = vsub.s32 7, %v879_v27 }
  0x97   :  { %v256_v29 = vpop.permute.xlu1 %255  ;;  %v118_v32 = vpop.permute.xlu0 %117 }
  0x98   :  { %v125_v39 = vmul.f32 %v123_v35, %v118_v32  ;;  %v265_v15 = vrot.slane %v16_v31, %v264_v6  ;;  %v281_v32 = vrot.slane %v17_v19, %v122_v30 }
  0x9a   :  { %v266_v24 = vmul.f32 %v265_v15, %v256_v29  ;;  %v267_v37 = vmul.f32 %v265_v15, %v881_v28 }
  0xd8   :  { %v773_v21 = vpop.f32.mrb[0].mxu0 }
  0xd9   :  { %v99_v22 = vpop.f32.mrb[1].mxu0  ;;  %v105_v38 = vadd.f32 %v773_v21, %v762_v36 }
  0xda   :  { %v100_v45 = vadd.f32 %v762_v36, %v99_v22  ;;  %v297_v36 = vrot.slane %v17_v19, %v148_v33 }
  0xdb   :  { %v127_v48 = vadd.f32 %v125_v39, %v105_v38 }
  0xdc   :  { %v126_v53 = vadd.f32 %v124_v44, %v100_v45 }
  0xf6   :  { %v144_v34 = vpop.permute.xlu1 %143 }
  0xf7   :  { %v151_v49 = vmul.f32 %v149_v40, %v144_v34 }
  0xf9   :  { %v153_v58 = vadd.f32 %v151_v49, %v127_v48 }
  0xfa   :  { %v139_v41 = vpop.permute.xlu0 %138  ;;  %v170_v42 = vpop.permute.xlu1 %169 }
  0xfb   :  { %v150_v47 = vmul.f32 %v149_v40, %v139_v41  ;;  %v177_v56 = vmul.f32 %v175_v46, %v170_v42 }
  0xfd   :  { %v152_v57 = vadd.f32 %v150_v47, %v126_v53  ;;  %v179_v2 = vadd.f32 %v177_v56, %v153_v58 }
  0xfe   :  { %v165_v50 = vpop.permute.xlu0 %164  ;;  %v196_v52 = vpop.permute.xlu1 %195 }
  0xff   :  { %v176_v54 = vmul.f32 %v175_v46, %v165_v50  ;;  %v203_v59 = vmul.f32 %v201_v51, %v196_v52 }
 0x101   :  { %v178_v62 = vadd.f32 %v176_v54, %v152_v57  ;;  %v205_v7 = vadd.f32 %v203_v59, %v179_v2 }
 0x102   :  { %v191_v60 = vpop.permute.xlu0 %190 }
 0x103   :  { %v202_v63 = vmul.f32 %v201_v51, %v191_v60  ;;  %v228_v0 = vpop.permute.xlu1 %227  ;;  %v221_v16 = vadd.f32 %v219_v11, %v205_v7 }
 0x104   :  { %v235_v17 = vmul.f32 %v233_v8, %v228_v0 }
 0x105   :  { %v204_v4 = vadd.f32 %v202_v63, %v178_v62 }
 0x106   :  { %v237_v26 = vadd.f32 %v235_v17, %v221_v16 }
 0x107   :  { %v244_v9 = vpop.permute.xlu0 %243  ;;  %v224_v10 = vpop.permute.xlu1 %223  ;;  %v220_v13 = vadd.f32 %v218_v5, %v204_v4 }
 0x108   :  { %v234_v14 = vmul.f32 %v233_v8, %v224_v10  ;;  %v251_v20 = vmul.f32 %v249_v12, %v244_v9 }
 0x10a   :  { %v236_v21 = vadd.f32 %v234_v14, %v220_v13  ;;  %v253_v25 = vadd.f32 %v251_v20, %v237_v26 }
 0x10b   :  { %v240_v18 = vpop.permute.xlu1 %239 }
 0x10c   :  { %v250_v22 = vmul.f32 %v249_v12, %v240_v18  ;;  %v272_v23 = vpop.permute.xlu0 %271  ;;  %v269_v41 = vadd.f32 %v267_v37, %v253_v25 }
 0x10d   :  { %v282_v38 = vmul.f32 %v281_v32, %v272_v23 }
 0x10e   :  { %v252_v27 = vadd.f32 %v250_v22, %v236_v21 }
 0x110   :  { %v268_v34 = vadd.f32 %v266_v24, %v252_v27  ;;  %v276_v35 = vpop.permute.xlu1 %275 }
 0x111   :  { %v288_v31 = vpop.permute.xlu0 %287  ;;  %v283_v39 = vmul.f32 %v281_v32, %v276_v35 }
 0x112   :  { %v284_v40 = vadd.f32 %v282_v38, %v268_v34  ;;  %v298_v42 = vmul.f32 %v297_v36, %v288_v31 }
 0x113   :  { %v285_v44 = vadd.f32 %v283_v39, %v269_v41 }
 0x114   :  { %v300_v46 = vadd.f32 %v298_v42, %v284_v40 }
 0x115   :  { %v292_v43 = vpop.permute.xlu1 %291 }
 0x116   :  { %v299_v45 = vmul.f32 %v297_v36, %v292_v43  ;;  %v302_v48 = vmul.f32 1.442695, %v300_v46 }
 0x118   :  { %v301_v29 = vadd.f32 %v299_v45, %v285_v44 }
 0x11a   :  { %v304_v47 = vmul.f32 1.442695, %v301_v29 }
 0x11c   :  { %798 = vpow2.f32 %v304_v47 }
 0x11d   :  { %800 = vpow2.f32 %v302_v48 }
 0x126   :  { %v799_v30 = vpop.eup %798 }
 0x127   :  { %310 = vrot.lane.b32.xlu1 %v799_v30, %s849_s1  ;;  %v801_v33 = vpop.eup %800 }
 0x12b   :  { %308 = vrot.lane.b32.xlu1 %v801_v33, %s849_s1 }
 0x199   :  { %v311_v28 = vpop.permute.xlu1 %310 }
 0x19a   :  { %v901_v49 = vadd.f32 %v799_v30, %v311_v28 }
 0x19c   :  { %320 = vrot.lane.b32.xlu0 %v901_v49, %s850_s23  ;;  %v355_v56 = vrot.slane %v901_v49, 1  ;;  %v417_v14 = vrot.slane %v901_v49, 2  ;;  %v936_v36 = vrot.slane %v901_v49, 3 }
 0x19d   :  { %v309_v50 = vpop.permute.xlu1 %308 }
 0x19e   :  { %v905_v51 = vadd.f32 %v801_v33, %v309_v50 }
 0x1a0   :  { %318 = vrot.lane.b32.xlu1 %v905_v51, %s850_s23  ;;  %v354_v57 = vrot.slane %v905_v51, 1  ;;  %v416_v15 = vrot.slane %v905_v51, 2  ;;  %v470_v31 = vrot.slane %v905_v51, 3 }
 0x20e   :  { %v321_v52 = vpop.permute.xlu0 %320 }
 0x20f   :  { %v325_v53 = vadd.f32 %v321_v52, %v901_v49 }
 0x211   :  { %330 = vrot.lane.b32.xlu0 %v325_v53, %s846_s17 }
 0x212   :  { %v319_v54 = vpop.permute.xlu1 %318 }
 0x213   :  { %v324_v55 = vadd.f32 %v319_v54, %v905_v51 }
 0x215   :  { %328 = vrot.lane.b32.xlu1 %v324_v55, %s846_s17 }
 0x219   :  { %362 = vrot.lane.b32.xlu1 %v355_v56, %s846_s17 }
 0x21d   :  { %380 = vrot.lane.b32.xlu1 %v355_v56, %s850_s23 }
 0x221   :  { %360 = vrot.lane.b32.xlu1 %v354_v57, %s846_s17 }
 0x225   :  { %378 = vrot.lane.b32.xlu1 %v354_v57, %s850_s23 }
 0x283   :  { %v331_v58 = vpop.permute.xlu0 %330 }
 0x284   :  { %v335_v59 = vadd.f32 %v331_v58, %v325_v53 }
 0x286   :  { %v338_v61 = vrot.slane %v335_v59, 7 }
 0x287   :  { %v329_v60 = vpop.permute.xlu1 %328 }
 0x288   :  { %v334_v62 = vadd.f32 %v329_v60, %v324_v55 }
 0x28a   :  { %v340_v63 = vsel %vm339_vm2, %v338_v61, %v334_v62 }
 0x28b   :  { %v343_v0 = vsel %vm342_vm3, %v340_v63, 0.0  ;;  %v363_v2 = vpop.permute.xlu1 %362 }
 0x28c   :  { %344 = vadd.xlane.f32.xlu0 %v343_v0 }
 0x28f   :  { %v381_v3 = vpop.permute.xlu1 %380 }
 0x293   :  { %v361_v7 = vpop.permute.xlu1 %360 }
 0x297   :  { %v379_v12 = vpop.permute.xlu1 %378 }
 0x319   :  { %v345_v1 = vpop.xlane.xlu0 %344 }
 0x31a   :  { %802 = vrcp.f32 %v345_v1  ;;  %v951_v1 = vrot.slane %v901_v49, 4 }
 0x324   :  { %v803_v4 = vpop.eup %802 }
 0x325   :  { %v352_v5 = vmul.f32 %v803_v4, %v324_v55  ;;  %v349_v6 = vrot.slane %v803_v4, 1 }
 0x327   :  { %v366_v8 = vmul.f32 %v361_v7, %v352_v5  ;;  %v353_v9 = vmul.f32 %v349_v6, %v325_v53  ;;  %v384_v13 = vmul.f32 %v379_v12, %v352_v5  ;;  %v358_v22 = vmul.f32 %v354_v57, %v352_v5 }
 0x329   :  { %370 = vrot.lane.b32.xlu1 %v366_v8, %s846_s17  ;;  %v367_v10 = vmul.f32 %v363_v2, %v353_v9  ;;  %v385_v11 = vmul.f32 %v381_v3, %v353_v9  ;;  %v359_v18 = vmul.f32 %v355_v56, %v353_v9  ;;  %v524_v2 = vrot.slane %v905_v51, 4 }
 0x32d   :  { %372 = vrot.lane.b32.xlu1 %v367_v10, %s846_s17 }
 0x331   :  { %390 = vrot.lane.b32.xlu1 %v385_v11, %s846_s17 }
 0x335   :  { %388 = vrot.lane.b32.xlu1 %v384_v13, %s846_s17 }
 0x339   :  { %424 = vrot.lane.b32.xlu1 %v417_v14, %s850_s23 }
 0x33d   :  { %442 = vrot.lane.b32.xlu1 %v417_v14, %s851_s24 }
 0x341   :  { %422 = vrot.lane.b32.xlu1 %v416_v15, %s850_s23 }
 0x345   :  { %432 = vrot.lane.b32.xlu1 %v416_v15, %s846_s17 }
 0x349   :  { %440 = vrot.lane.b32.xlu1 %v416_v15, %s851_s24 }
 0x39b   :  { %v371_v16 = vpop.permute.xlu1 %370 }
 0x39c   :  { %v376_v26 = vadd.f32 %v371_v16, %v358_v22 }
 0x39f   :  { %v373_v17 = vpop.permute.xlu1 %372 }
 0x3a0   :  { %v377_v20 = vadd.f32 %v373_v17, %v359_v18 }
 0x3a3   :  { %v391_v19 = vpop.permute.xlu1 %390 }
 0x3a4   :  { %v395_v21 = vadd.f32 %v391_v19, %v367_v10 }
 0x3a6   :  { %v397_v23 = vadd.f32 %v395_v21, %v377_v20 }
 0x3a7   :  { %v389_v24 = vpop.permute.xlu1 %388 }
 0x3a8   :  { %v394_v27 = vadd.f32 %v389_v24, %v366_v8  ;;  %v400_v32 = vrot.slane %v397_v23, 7 }
 0x3aa   :  { %v396_v25 = vadd.f32 %v394_v27, %v376_v26 }
 0x3ab   :  { %v425_v37 = vpop.permute.xlu1 %424 }
 0x3ac   :  { %v401_v34 = vsel %vm339_vm2, %v400_v32, %v396_v25 }
 0x3ad   :  { %v403_v35 = vsel %vm342_vm3, %v401_v34, 0.0 }
 0x3ae   :  { %404 = vadd.xlane.f32.xlu0 %v403_v35 }
 0x3af   :  { %v443_v38 = vpop.permute.xlu1 %442 }
 0x3b3   :  { %v423_v40 = vpop.permute.xlu1 %422 }
 0x3b7   :  { %v433_v41 = vpop.permute.xlu1 %432 }
 0x3bb   :  { %v441_v46 = vpop.permute.xlu1 %440 }
 0x3c4   :  { %434 = vrot.lane.b32.xlu0 %v417_v14, %s846_s17 }
 0x3c8   :  { %478 = vrot.lane.b32.xlu0 %v936_v36, %s850_s23 }
 0x3cc   :  { %488 = vrot.lane.b32.xlu0 %v936_v36, %s846_s17 }
 0x3d0   :  { %496 = vrot.lane.b32.xlu0 %v936_v36, %s851_s24 }
 0x3d4   :  { %476 = vrot.lane.b32.xlu0 %v470_v31, %s850_s23 }
 0x3d8   :  { %486 = vrot.lane.b32.xlu0 %v470_v31, %s846_s17 }
 0x3dc   :  { %494 = vrot.lane.b32.xlu0 %v470_v31, %s851_s24 }
 0x43b   :  { %v405_v39 = vpop.xlane.xlu0 %404 }
 0x43c   :  { %804 = vrcp.f32 %v405_v39  ;;  %v980_v39 = vrot.slane %v901_v49, 6 }
 0x43f   :  { %v435_v33 = vpop.permute.xlu0 %434 }
 0x443   :  { %v479_v3 = vpop.permute.xlu0 %478 }
 0x446   :  { %v805_v42 = vpop.eup %804 }
 0x447   :  { %v409_v43 = vrot.slane %v805_v42, 1  ;;  %v412_v44 = vmul.f32 %v805_v42, %v376_v26  ;;  %v414_v45 = vmul.f32 %v805_v42, %v394_v27  ;;  %v489_v4 = vpop.permute.xlu0 %488 }
 0x449   :  { %v413_v29 = vmul.f32 %v409_v43, %v377_v20  ;;  %v415_v47 = vmul.f32 %v409_v43, %v395_v21  ;;  %v420_v48 = vmul.f32 %v416_v15, %v412_v44  ;;  %v428_v30 = vmul.f32 %v423_v40, %v414_v45 }
 0x44a   :  { %v438_v28 = vmul.f32 %v433_v41, %v412_v44  ;;  %v446_v50 = vmul.f32 %v441_v46, %v414_v45  ;;  %v987_v40 = vrot.slane %v905_v51, 6 }
 0x44b   :  { %v421_v52 = vmul.f32 %v417_v14, %v413_v29  ;;  %v429_v53 = vmul.f32 %v425_v37, %v415_v47  ;;  %v447_v54 = vmul.f32 %v443_v38, %v415_v47  ;;  %v439_v55 = vmul.f32 %v435_v33, %v413_v29  ;;  %v497_v5 = vpop.permute.xlu0 %496 }
 0x44c   :  { %v430_v58 = vadd.f32 %v428_v30, %v420_v48  ;;  %v448_v59 = vadd.f32 %v446_v50, %v438_v28 }
 0x44d   :  { %v431_v56 = vadd.f32 %v429_v53, %v421_v52  ;;  %v449_v57 = vadd.f32 %v447_v54, %v439_v55 }
 0x44e   :  { %v450_v62 = vadd.f32 %v448_v59, %v430_v58 }
 0x44f   :  { %v451_v60 = vadd.f32 %v449_v57, %v431_v56  ;;  %v477_v7 = vpop.permute.xlu0 %476 }
 0x451   :  { %v454_v61 = vrot.slane %v451_v60, 7 }
 0x453   :  { %v455_v63 = vsel %vm339_vm2, %v454_v61, %v450_v62  ;;  %v487_v8 = vpop.permute.xlu0 %486 }
 0x454   :  { %v457_v0 = vsel %vm342_vm3, %v455_v63, 0.0 }
 0x455   :  { %458 = vadd.xlane.f32.xlu1 %v457_v0 }
 0x457   :  { %v495_v13 = vpop.permute.xlu0 %494 }
 0x466   :  { %532 = vrot.lane.b32.xlu1 %v951_v1, %s850_s23 }
 0x46a   :  { %542 = vrot.lane.b32.xlu1 %v951_v1, %s846_s17 }
 0x46e   :  { %550 = vrot.lane.b32.xlu1 %v951_v1, %s851_s24 }
 0x472   :  { %540 = vrot.lane.b32.xlu1 %v524_v2, %s846_s17 }
 0x476   :  { %548 = vrot.lane.b32.xlu1 %v524_v2, %s851_s24 }
 0x4e2   :  { %v459_v6 = vpop.xlane.xlu1 %458 }
 0x4e3   :  { %806 = vrcp.f32 %v459_v6 }
 0x4e6   :  { %v533_v41 = vpop.permute.xlu1 %532 }
 0x4ea   :  { %v543_v42 = vpop.permute.xlu1 %542 }
 0x4ed   :  { %v807_v9 = vpop.eup %806 }
 0x4ee   :  { %v463_v10 = vrot.slane %v807_v9, 1  ;;  %v466_v11 = vmul.f32 %v807_v9, %v430_v58  ;;  %v468_v12 = vmul.f32 %v807_v9, %v448_v59  ;;  %v551_v44 = vpop.permute.xlu1 %550 }
 0x4f0   :  { %v467_v14 = vmul.f32 %v463_v10, %v431_v56  ;;  %v469_v15 = vmul.f32 %v463_v10, %v449_v57  ;;  %v474_v16 = vmul.f32 %v470_v31, %v466_v11  ;;  %v482_v17 = vmul.f32 %v477_v7, %v468_v12 }
 0x4f1   :  { %v492_v18 = vmul.f32 %v487_v8, %v466_v11  ;;  %v500_v19 = vmul.f32 %v495_v13, %v468_v12  ;;  %v967_v31 = vrot.slane %v901_v49, 5 }
 0x4f2   :  { %v475_v20 = vmul.f32 %v936_v36, %v467_v14  ;;  %v483_v21 = vmul.f32 %v479_v3, %v469_v15  ;;  %v493_v22 = vmul.f32 %v489_v4, %v467_v14  ;;  %v501_v23 = vmul.f32 %v497_v5, %v469_v15  ;;  %v541_v45 = vpop.permute.xlu1 %540 }
 0x4f3   :  { %v484_v26 = vadd.f32 %v482_v17, %v474_v16  ;;  %v502_v27 = vadd.f32 %v500_v19, %v492_v18  ;;  %v578_v36 = vrot.slane %v905_v51, 5 }
 0x4f4   :  { %v485_v24 = vadd.f32 %v483_v21, %v475_v20  ;;  %v503_v32 = vadd.f32 %v501_v23, %v493_v22 }
 0x4f5   :  { %v504_v34 = vadd.f32 %v502_v27, %v484_v26 }
 0x4f6   :  { %v505_v25 = vadd.f32 %v503_v32, %v485_v24  ;;  %v549_v30 = vpop.permute.xlu1 %548 }
 0x4f8   :  { %v508_v35 = vrot.slane %v505_v25, 7 }
 0x4fa   :  { %v509_v37 = vsel %vm339_vm2, %v508_v35, %v504_v34 }
 0x4fb   :  { %v511_v38 = vsel %vm342_vm3, %v509_v37, 0.0 }
 0x4fc   :  { %512 = vadd.xlane.f32.xlu0 %v511_v38 }
 0x512   :  { %530 = vrot.lane.b32.xlu0 %v524_v2, %s850_s23 }
 0x516   :  { %586 = vrot.lane.b32.xlu0 %v967_v31, %s850_s23 }
 0x51a   :  { %596 = vrot.lane.b32.xlu0 %v967_v31, %s846_s17 }
 0x51e   :  { %604 = vrot.lane.b32.xlu0 %v967_v31, %s851_s24 }
 0x522   :  { %584 = vrot.lane.b32.xlu0 %v578_v36, %s850_s23 }
 0x526   :  { %594 = vrot.lane.b32.xlu0 %v578_v36, %s846_s17 }
 0x52a   :  { %602 = vrot.lane.b32.xlu0 %v578_v36, %s851_s24 }
 0x52e   :  { %640 = vrot.lane.b32.xlu0 %v980_v39, %s850_s23 }
 0x532   :  { %658 = vrot.lane.b32.xlu0 %v980_v39, %s851_s24 }
 0x536   :  { %638 = vrot.lane.b32.xlu0 %v987_v40, %s850_s23 }
 0x53a   :  { %648 = vrot.lane.b32.xlu0 %v987_v40, %s846_s17 }
 0x53e   :  { %656 = vrot.lane.b32.xlu0 %v987_v40, %s851_s24 }
 0x589   :  { %v513_v43 = vpop.xlane.xlu0 %512 }
 0x58a   :  { %808 = vrcp.f32 %v513_v43 }
 0x58d   :  { %v531_v50 = vpop.permute.xlu0 %530 }
 0x591   :  { %v587_v6 = vpop.permute.xlu0 %586 }
 0x594   :  { %v809_v46 = vpop.eup %808 }
 0x595   :  { %v520_v29 = vmul.f32 %v809_v46, %v484_v26  ;;  %v522_v47 = vmul.f32 %v809_v46, %v502_v27  ;;  %v517_v48 = vrot.slane %v809_v46, 1  ;;  %v597_v7 = vpop.permute.xlu0 %596 }
 0x597   :  { %v528_v33 = vmul.f32 %v524_v2, %v520_v29  ;;  %v546_v28 = vmul.f32 %v541_v45, %v520_v29  ;;  %v554_v52 = vmul.f32 %v549_v30, %v522_v47  ;;  %v536_v53 = vmul.f32 %v531_v50, %v522_v47 }
 0x598   :  { %v521_v54 = vmul.f32 %v517_v48, %v485_v24  ;;  %v523_v55 = vmul.f32 %v517_v48, %v503_v32 }
 0x599   :  { %v556_v60 = vadd.f32 %v554_v52, %v546_v28  ;;  %v538_v61 = vadd.f32 %v536_v53, %v528_v33  ;;  %v605_v8 = vpop.permute.xlu0 %604 }
 0x59a   :  { %v529_v56 = vmul.f32 %v951_v1, %v521_v54  ;;  %v537_v57 = vmul.f32 %v533_v41, %v523_v55  ;;  %v547_v58 = vmul.f32 %v543_v42, %v521_v54  ;;  %v555_v59 = vmul.f32 %v551_v44, %v523_v55 }
 0x59b   :  { %v558_v3 = vadd.f32 %v556_v60, %v538_v61 }
 0x59c   :  { %v539_v62 = vadd.f32 %v537_v57, %v529_v56  ;;  %v557_v63 = vadd.f32 %v555_v59, %v547_v58 }
 0x59d   :  { %v585_v1 = vpop.permute.xlu0 %584 }
 0x59e   :  { %v559_v0 = vadd.f32 %v557_v63, %v539_v62 }
 0x5a0   :  { %v562_v4 = vrot.slane %v559_v0, 7 }
 0x5a1   :  { %v595_v10 = vpop.permute.xlu0 %594 }
 0x5a2   :  { %v563_v2 = vsel %vm339_vm2, %v562_v4, %v558_v3 }
 0x5a3   :  { %v565_v5 = vsel %vm342_vm3, %v563_v2, 0.0 }
 0x5a4   :  { %566 = vadd.xlane.f32.xlu1 %v565_v5 }
 0x5a5   :  { %v603_v15 = vpop.permute.xlu0 %602 }
 0x5a9   :  { %v641_v43 = vpop.permute.xlu0 %640 }
 0x5ad   :  { %v659_v44 = vpop.permute.xlu0 %658 }
 0x5b1   :  { %v639_v46 = vpop.permute.xlu0 %638 }
 0x631   :  { %v567_v9 = vpop.xlane.xlu1 %566 }
 0x632   :  { %810 = vrcp.f32 %v567_v9 }
 0x63c   :  { %v811_v11 = vpop.eup %810 }
 0x63d   :  { %v571_v12 = vrot.slane %v811_v11, 1  ;;  %v574_v13 = vmul.f32 %v811_v11, %v538_v61  ;;  %v576_v14 = vmul.f32 %v811_v11, %v556_v60 }
 0x63f   :  { %v575_v16 = vmul.f32 %v571_v12, %v539_v62  ;;  %v577_v17 = vmul.f32 %v571_v12, %v557_v63  ;;  %v582_v18 = vmul.f32 %v578_v36, %v574_v13  ;;  %v590_v19 = vmul.f32 %v585_v1, %v576_v14 }
 0x640   :  { %v600_v20 = vmul.f32 %v595_v10, %v574_v13  ;;  %v608_v21 = vmul.f32 %v603_v15, %v576_v14  ;;  %v686_v36 = vrot.slane %v905_v51, 7 }
 0x641   :  { %v583_v22 = vmul.f32 %v967_v31, %v575_v16  ;;  %v591_v23 = vmul.f32 %v587_v6, %v577_v17  ;;  %v601_v24 = vmul.f32 %v597_v7, %v575_v16  ;;  %v609_v26 = vmul.f32 %v605_v8, %v577_v17 }
 0x642   :  { %v592_v32 = vadd.f32 %v590_v19, %v582_v18  ;;  %v610_v25 = vadd.f32 %v608_v21, %v600_v20  ;;  %v687_v31 = vrot.slane %v901_v49, 7  ;;  %v649_v49 = vpop.permute.xlu0 %648 }
 0x643   :  { %v593_v27 = vadd.f32 %v591_v23, %v583_v22  ;;  %v611_v34 = vadd.f32 %v609_v26, %v601_v24 }
 0x644   :  { %v612_v37 = vadd.f32 %v610_v25, %v592_v32 }
 0x645   :  { %v613_v35 = vadd.f32 %v611_v34, %v593_v27 }
 0x646   :  { %v657_v33 = vpop.permute.xlu0 %656 }
 0x647   :  { %v616_v38 = vrot.slane %v613_v35, 7 }
 0x649   :  { %v617_v41 = vsel %vm339_vm2, %v616_v38, %v612_v37 }
 0x64a   :  { %v619_v42 = vsel %vm342_vm3, %v617_v41, 0.0 }
 0x64b   :  { %620 = vadd.xlane.f32.xlu1 %v619_v42 }
 0x65c   :  { %650 = vrot.lane.b32.xlu1 %v980_v39, %s846_s17 }
 0x660   :  { %694 = vrot.lane.b32.xlu1 %v687_v31, %s850_s23 }
 0x664   :  { %704 = vrot.lane.b32.xlu1 %v687_v31, %s846_s17 }
 0x668   :  { %712 = vrot.lane.b32.xlu1 %v687_v31, %s851_s24 }
 0x66c   :  { %692 = vrot.lane.b32.xlu1 %v686_v36, %s850_s23 }
 0x670   :  { %702 = vrot.lane.b32.xlu1 %v686_v36, %s846_s17 }
 0x674   :  { %710 = vrot.lane.b32.xlu1 %v686_v36, %s851_s24 }
 0x6d8   :  { %v621_v45 = vpop.xlane.xlu1 %620 }
 0x6d9   :  { %812 = vrcp.f32 %v621_v45 }
 0x6dc   :  { %v651_v53 = vpop.permute.xlu1 %650 }
 0x6e0   :  { %v695_v5 = vpop.permute.xlu1 %694 }
 0x6e3   :  { %v813_v29 = vpop.eup %812 }
 0x6e4   :  { %v625_v47 = vrot.slane %v813_v29, 1  ;;  %v628_v48 = vmul.f32 %v813_v29, %v592_v32  ;;  %v630_v30 = vmul.f32 %v813_v29, %v610_v25  ;;  %v705_v6 = vpop.permute.xlu1 %704 }
 0x6e6   :  { %v629_v28 = vmul.f32 %v625_v47, %v593_v27  ;;  %v631_v50 = vmul.f32 %v625_v47, %v611_v34  ;;  %v636_v51 = vmul.f32 %v987_v40, %v628_v48  ;;  %v644_v52 = vmul.f32 %v639_v46, %v630_v30 }
 0x6e7   :  { %v654_v54 = vmul.f32 %v649_v49, %v628_v48  ;;  %v662_v55 = vmul.f32 %v657_v33, %v630_v30 }
 0x6e8   :  { %v637_v56 = vmul.f32 %v980_v39, %v629_v28  ;;  %v645_v57 = vmul.f32 %v641_v43, %v631_v50  ;;  %v655_v58 = vmul.f32 %v651_v53, %v629_v28  ;;  %v663_v59 = vmul.f32 %v659_v44, %v631_v50  ;;  %v713_v7 = vpop.permute.xlu1 %712 }
 0x6e9   :  { %v646_v62 = vadd.f32 %v644_v52, %v636_v51  ;;  %v664_v63 = vadd.f32 %v662_v55, %v654_v54 }
 0x6ea   :  { %v647_v60 = vadd.f32 %v645_v57, %v637_v56  ;;  %v665_v61 = vadd.f32 %v663_v59, %v655_v58 }
 0x6eb   :  { %v666_v4 = vadd.f32 %v664_v63, %v646_v62 }
 0x6ec   :  { %v667_v0 = vadd.f32 %v665_v61, %v647_v60  ;;  %v693_v39 = vpop.permute.xlu1 %692 }
 0x6ee   :  { %v670_v3 = vrot.slane %v667_v0, 7 }
 0x6f0   :  { %v671_v2 = vsel %vm339_vm2, %v670_v3, %v666_v4  ;;  %v703_v9 = vpop.permute.xlu1 %702 }
 0x6f1   :  { %v673_v40 = vsel %vm342_vm3, %v671_v2, 0.0 }
 0x6f2   :  { %674 = vadd.xlane.f32.xlu0 %v673_v40 }
 0x6f4   :  { %v711_v13 = vpop.permute.xlu1 %710 }
 0x77f   :  { %v675_v8 = vpop.xlane.xlu0 %674 }
 0x780   :  { %814 = vrcp.f32 %v675_v8 }
 0x78a   :  { %v815_v1 = vpop.eup %814 }
 0x78b   :  { %v679_v10 = vrot.slane %v815_v1, 1  ;;  %v682_v11 = vmul.f32 %v815_v1, %v646_v62  ;;  %v684_v12 = vmul.f32 %v815_v1, %v664_v63 }
 0x78d   :  { %v683_v14 = vmul.f32 %v679_v10, %v647_v60  ;;  %v685_v15 = vmul.f32 %v679_v10, %v665_v61  ;;  %v690_v16 = vmul.f32 %v686_v36, %v682_v11  ;;  %v698_v17 = vmul.f32 %v693_v39, %v684_v12 }
 0x78e   :  { %v708_v18 = vmul.f32 %v703_v9, %v682_v11  ;;  %v716_v19 = vmul.f32 %v711_v13, %v684_v12 }
 0x78f   :  { %v691_v20 = vmul.f32 %v687_v31, %v683_v14  ;;  %v699_v21 = vmul.f32 %v695_v5, %v685_v15  ;;  %v709_v22 = vmul.f32 %v705_v6, %v683_v14  ;;  %v717_v23 = vmul.f32 %v713_v7, %v685_v15 }
 0x790   :  { %v700_v26 = vadd.f32 %v698_v17, %v690_v16  ;;  %v718_v27 = vadd.f32 %v716_v19, %v708_v18 }
 0x791   :  { %v701_v24 = vadd.f32 %v699_v21, %v691_v20  ;;  %v719_v32 = vadd.f32 %v717_v23, %v709_v22 }
 0x792   :  { %v720_v34 = vadd.f32 %v718_v27, %v700_v26 }
 0x793   :  { %v721_v25 = vadd.f32 %v719_v32, %v701_v24 }
 0x795   :  { %v724_v35 = vrot.slane %v721_v25, 7 }
 0x797   :  { %v725_v37 = vsel %vm339_vm2, %v724_v35, %v720_v34 }
 0x798   :  { %v727_v38 = vsel %vm342_vm3, %v725_v37, 0.0 }
 0x799   :  { %728 = vadd.xlane.f32.xlu1 %v727_v38 }
 0x826   :  { %v729_v41 = vpop.xlane.xlu1 %728 }
 0x827   :  { %816 = vrcp.f32 %v729_v41 }
 0x831   :  { %v817_v42 = vpop.eup %816 }
 0x832   :  { %v733_v36 = vrot.slane %v817_v42, 1  ;;  %v736_v31 = vmul.f32 %v817_v42, %v700_v26  ;;  %v738_v44 = vmul.f32 %v817_v42, %v718_v27 }
 0x834   :  { %v737_v43 = vmul.f32 %v733_v36, %v701_v24  ;;  %v739_v45 = vmul.f32 %v733_v36, %v719_v32  ;;  %v740_v49 = vadd.f32 %v738_v44, %v736_v31 }
 0x836   :  { %v741_v46 = vadd.f32 %v739_v45, %v737_v43 }
 0x838   :  { %v744_v29 = vrot.slane %v741_v46, 7 }
 0x83a   :  { %v745_v47 = vsel %vm339_vm2, %v744_v29, %v740_v49 }
 0x83b   :  { %747 = vst.msk [vmem:[#allocation2] sm:$0x3] %vm342_vm3, %v745_v47 }
 0x83c   :  { %829 = shalt.err (!%p826_p4)
}
 0x83d   :  { %s830_s30 = scalar_lea.hbm %s1033_s2, 32 }
 0x83e   :  { %p831_p5 = scmp.ne.s32.totalorder %s1033_s2, %s830_s30  ;;  %p834_p6 = scmp.lt.u32.totalorder %s830_s30, %s1033_s2 }
 0x840   :  { %p836_p7 = pnand %p834_p6, %p831_p5 }
 0x842   :  { %839 = shalt.err (!%p836_p7)
}
 0x843   :  { %757 = dma.vmem_to_hbm [thread:$0]  %s755_s26, 32, %s1033_s2, [#allocation3]  }
 0x844   :  { %840 = dma.done.wait [#allocation3], 32  }
 0x845   :  { %841 = vsyncadd [#allocation3], 4294967264 }
 0x846   :  { %761 = vsyncpa [#allocation3], 1 }

</bundles_post_ra>
